<compile_context>
chip_gen: v7x
topology: tpu7x:2x2x1
jax: 0.10.0
libtpu: 0.0.40
codegen_flags: <defaults>
</compile_context>

<pallas_src>
import jax
import jax.numpy as jnp
from jax.experimental import pallas as pl
from jax.experimental.pallas import tpu as pltpu


HIDDEN_PAD = 128  # hidden dim 50 zero-padded up to a full lane width (weights only)


def _mlp_softmax2_kernel(x_ref, w1_ref, b1_ref, dw_ref, db_ref, o_ref):
    # ---- layer 1: hidden = relu(x @ W1 + b1) ------------------------------------
    # bf16 cast happens here (in-kernel, under DMA slack) instead of in the wrapper.
    xb = x_ref[...].astype(jnp.bfloat16)
    h = jnp.dot(xb, w1_ref[...], preferred_element_type=jnp.float32)   # (tb, 128) f32
    h = jnp.maximum(h + b1_ref[...], 0.0)                              # lane-dense ReLU

    # ---- layer 2 + 2-class softmax folded into sigmoid(logit1 - logit0) ---------
    d = jnp.dot(h, dw_ref[...], preferred_element_type=jnp.float32)    # (tb, 1)
    z = jnp.transpose(d) + db_ref[...]                                  # (1, tb) lane-dense
    p1 = pl.reciprocal(1.0 + jnp.exp(-z))        # exact reciprocal; exp goes to EUP
    o_ref[0:1, :] = 1.0 - p1                     # row 0: P(class 0)
    o_ref[1:2, :] = p1                           # row 1: P(class 1)


def simple_url_classifier(x, params, *, block_b=8192):
    """x: [B, 100] float32 (or bfloat16). Returns [B, 2] softmax probabilities (f32)."""
    w1p, b1p, dw, db = params
    B, F_in = x.shape

    if B <= block_b:
        tb = B                      # single full-array tile (any B is legal)
    else:
        tb = block_b                # multi-tile: last dim of the (2, tb) out block
        assert tb % 128 == 0        # must be a multiple of 128 (lane-dense)
    num_tiles = pl.cdiv(B, tb)      # ragged last block handled by Pallas masking

    # Advisory cost: memory-bound, cheap per element.
    bytes_accessed = int(B * (F_in * 4 + 2 * 4)
                         + w1p.size * 2 + (b1p.size + dw.size + db.size) * 4)
    cost = pl.CostEstimate(
        flops=int(2 * B * F_in * HIDDEN_PAD + 2 * B * HIDDEN_PAD),
        transcendentals=int(B),
        bytes_accessed=bytes_accessed,
    )

    weight_buf = pl.Buffered(1)     # constant block index -> no double-buffering

    out_t = pl.pallas_call(
        _mlp_softmax2_kernel,
        out_shape=jax.ShapeDtypeStruct((2, B), jnp.float32),
        grid=(num_tiles,),
        in_specs=[
            pl.BlockSpec((tb, F_in), lambda i: (i, 0)),            # x tile walks the batch
            pl.BlockSpec(w1p.shape, lambda i: (0, 0), pipeline_mode=weight_buf),
            pl.BlockSpec(b1p.shape, lambda i: (0, 0), pipeline_mode=weight_buf),
            pl.BlockSpec(dw.shape, lambda i: (0, 0), pipeline_mode=weight_buf),
            pl.BlockSpec(db.shape, lambda i: (0, 0), pipeline_mode=weight_buf),
        ],
        out_specs=pl.BlockSpec((2, tb), lambda i: (0, i)),          # lane-dense [2, B] out
        compiler_params=pltpu.CompilerParams(
            # TODO(synk): on v7x, verify with xprof that the batch grid splits across
            # both TensorCores; if one TC is idle switch to (pltpu.CORE_PARALLEL,).
            dimension_semantics=("parallel",),
            vmem_limit_bytes=48 * 1024 * 1024,   # headroom for tb=8192 on all gens
        ),
        cost_estimate=cost,
    )(x, w1p, b1p, dw, db)

    return out_t.T                  # tiny [2, B] -> [B, 2] transpose in the wrapper


def init_params(key):
    """PyTorch nn.Linear default init: U(-1/sqrt(fan_in), 1/sqrt(fan_in)),
    PyTorch layout: W1 [50,100], b1 [50], W2 [2,50], b2 [2]."""
    k1, k2, k3, k4 = jax.random.split(key, 4)
    bound1 = 1.0 / jnp.sqrt(100.0)
    bound2 = 1.0 / jnp.sqrt(50.0)
    w1 = jax.random.uniform(k1, (50, 100), jnp.float32, -bound1, bound1)
    b1 = jax.random.uniform(k2, (50,), jnp.float32, -bound1, bound1)
    w2 = jax.random.uniform(k3, (2, 50), jnp.float32, -bound2, bound2)
    b2 = jax.random.uniform(k4, (2,), jnp.float32, -bound2, bound2)
    return w1, b1, w2, b2


def prepare_params(w1, b1, w2, b2):
    """Repack PyTorch-layout params into kernel layout:
       - W1 transposed to [in, out], hidden padded 50->128, cast to bf16,
       - b1 padded to [1, 128] (f32),
       - layer 2 + 2-class softmax folded into (dw, db) for the sigmoid identity
         (dw = W2[1]-W2[0] padded to [128,1], db = b2[1]-b2[0])."""
    h, f_in = w1.shape
    w1p = jnp.zeros((f_in, HIDDEN_PAD), jnp.float32).at[:, :h].set(w1.T)
    w1p = w1p.astype(jnp.bfloat16)
    b1p = jnp.zeros((1, HIDDEN_PAD), jnp.float32).at[0, :h].set(b1)
    dw = jnp.zeros((HIDDEN_PAD, 1), jnp.float32).at[:h, 0].set(w2[1] - w2[0])
    db = jnp.reshape(b2[1] - b2[0], (1, 1)).astype(jnp.float32)
    return w1p, b1p, dw, db


if __name__ == "__main__":
    key = jax.random.PRNGKey(0)
    k_params, k_x = jax.random.split(key)
    w1, b1, w2, b2 = init_params(k_params)
    params = prepare_params(w1, b1, w2, b2)

    B = 8  # small demo batch
    x = jax.random.normal(k_x, (B, 100), jnp.float32)

    out = jax.block_until_ready(simple_url_classifier(x, params))

    # sanity: shape + rows sum to 1 (softmax)
    assert out.shape == (B, 2)
    assert jnp.allclose(jnp.sum(out, axis=1), 1.0, atol=1e-5)

    # reference check against plain JAX (same bf16 rounding of x/W1 the kernel sees)
    xb = x.astype(jnp.bfloat16).astype(jnp.float32)
    w1b = w1.astype(jnp.bfloat16).astype(jnp.float32)
    ref_h = jnp.maximum(xb @ w1b.T + b1, 0.0)
    ref_logits = ref_h @ w2.T + b2
    ref = jax.nn.softmax(ref_logits, axis=1)
    assert jnp.allclose(out, ref, atol=2e-3, rtol=2e-3), "mismatch vs reference"

    print("KERNEL_OK")
</pallas_src>

<mosaic_0001>
module attributes {stable_mosaic.version = 11 : i64} {
  func.func @_mlp_softmax2_kernel(%arg0: i32, %arg1: memref<8x100xf32, #tpu.memory_space<vmem>>, %arg2: memref<100x128xbf16, #tpu.memory_space<vmem>>, %arg3: memref<1x128xf32, #tpu.memory_space<vmem>>, %arg4: memref<128x1xf32, #tpu.memory_space<vmem>>, %arg5: memref<1x1xf32, #tpu.memory_space<vmem>>, %arg6: memref<2x8xf32, #tpu.memory_space<vmem>>) attributes {dimension_semantics = [#tpu.dimension_semantics<parallel>], iteration_bounds = array<i64: 1>, scalar_prefetch = 0 : i64, scratch_operands = 0 : i64, tpu.core_type = #tpu.core_type<tc>, window_params = [{transform_indices = @transform_0, window_bounds = array<i64: 8, 100>}, {pipeline_mode = #tpu.pipeline_mode<synchronous>, transform_indices = @transform_1, window_bounds = array<i64: 100, 128>}, {pipeline_mode = #tpu.pipeline_mode<synchronous>, transform_indices = @transform_2, window_bounds = array<i64: 1, 128>}, {pipeline_mode = #tpu.pipeline_mode<synchronous>, transform_indices = @transform_3, window_bounds = array<i64: 128, 1>}, {pipeline_mode = #tpu.pipeline_mode<synchronous>, transform_indices = @transform_4, window_bounds = array<i64: 1, 1>}, {transform_indices = @transform_5, window_bounds = array<i64: 2, 8>}]} {
    %c0 = arith.constant 0 : index
    %c0_0 = arith.constant 0 : index
    %0 = vector.load %arg1[%c0, %c0_0] : memref<8x100xf32, #tpu.memory_space<vmem>>, vector<8x100xf32>
    %1 = arith.truncf %0 : vector<8x100xf32> to vector<8x100xbf16>
    %c0_1 = arith.constant 0 : index
    %c0_2 = arith.constant 0 : index
    %2 = vector.load %arg2[%c0_1, %c0_2] : memref<100x128xbf16, #tpu.memory_space<vmem>>, vector<100x128xbf16>
    %cst = arith.constant dense<0.000000e+00> : vector<8x128xf32>
    %3 = tpu.matmul %1, %2, %cst {dimension_numbers = #tpu.dot_dimension_numbers<[1], [0], [0], [1], [0, 0, 1, 1], [], []>} : vector<8x100xbf16>, vector<100x128xbf16>, vector<8x128xf32> -> vector<8x128xf32>
    %c0_3 = arith.constant 0 : index
    %c0_4 = arith.constant 0 : index
    %4 = vector.load %arg3[%c0_3, %c0_4] : memref<1x128xf32, #tpu.memory_space<vmem>>, vector<1x128xf32>
    %5 = vector.broadcast %4 : vector<1x128xf32> to vector<8x128xf32>
    %6 = arith.addf %3, %5 : vector<8x128xf32>
    %cst_5 = arith.constant 0.000000e+00 : f32
    %7 = vector.broadcast %cst_5 : f32 to vector<8x128xf32>
    %8 = arith.maximumf %6, %7 : vector<8x128xf32>
    %c0_6 = arith.constant 0 : index
    %c0_7 = arith.constant 0 : index
    %9 = vector.load %arg4[%c0_6, %c0_7] : memref<128x1xf32, #tpu.memory_space<vmem>>, vector<128x1xf32>
    %cst_8 = arith.constant dense<0.000000e+00> : vector<8x1xf32>
    %10 = tpu.matmul %8, %9, %cst_8 {dimension_numbers = #tpu.dot_dimension_numbers<[1], [0], [0], [1], [0, 0, 1, 1], [], []>} : vector<8x128xf32>, vector<128x1xf32>, vector<8x1xf32> -> vector<8x1xf32>
    %11 = tpu.transpose %10, [1, 0] : vector<8x1xf32> -> vector<1x8xf32>
    %c0_9 = arith.constant 0 : index
    %c0_10 = arith.constant 0 : index
    %12 = vector.load %arg5[%c0_9, %c0_10] : memref<1x1xf32, #tpu.memory_space<vmem>>, vector<1x1xf32>
    %13 = vector.broadcast %12 : vector<1x1xf32> to vector<1x8xf32>
    %14 = arith.addf %11, %13 : vector<1x8xf32>
    %cst_11 = arith.constant 0.000000e+00 : f32
    %15 = vector.broadcast %cst_11 : f32 to vector<1x8xf32>
    %16 = arith.subf %15, %14 : vector<1x8xf32>
    %17 = math.exp %16 : vector<1x8xf32>
    %cst_12 = arith.constant 1.000000e+00 : f32
    %18 = vector.broadcast %cst_12 : f32 to vector<1x8xf32>
    %19 = arith.addf %18, %17 : vector<1x8xf32>
    %20 = tpu.reciprocal %19 : vector<1x8xf32> -> vector<1x8xf32>
    %cst_13 = arith.constant 1.000000e+00 : f32
    %21 = vector.broadcast %cst_13 : f32 to vector<1x8xf32>
    %22 = arith.subf %21, %20 : vector<1x8xf32>
    %c0_14 = arith.constant 0 : index
    %c0_15 = arith.constant 0 : index
    %23 = vector.load %arg6[%c0_14, %c0_15] : memref<2x8xf32, #tpu.memory_space<vmem>>, vector<1x8xf32>
    tpu.vector_store %arg6[%c0_14, %c0_15], %22 {strides = array<i32>} : memref<2x8xf32, #tpu.memory_space<vmem>>, vector<1x8xf32>,
    %c1 = arith.constant 1 : index
    %c0_16 = arith.constant 0 : index
    %24 = vector.load %arg6[%c1, %c0_16] : memref<2x8xf32, #tpu.memory_space<vmem>>, vector<1x8xf32>
    tpu.vector_store %arg6[%c1, %c0_16], %20 {strides = array<i32>} : memref<2x8xf32, #tpu.memory_space<vmem>>, vector<1x8xf32>,
    return
  }
  func.func @transform_0(%arg0: i32) -> (i32, i32) {
    %c0_i32 = arith.constant 0 : i32
    %c0_i32_0 = arith.constant 0 : i32
    return %arg0, %c0_i32 : i32, i32
  }
  func.func @transform_1(%arg0: i32) -> (i32, i32) {
    %c0_i32 = arith.constant 0 : i32
    %c0_i32_0 = arith.constant 0 : i32
    %c0_i32_1 = arith.constant 0 : i32
    return %c0_i32, %c0_i32_0 : i32, i32
  }
  func.func @transform_2(%arg0: i32) -> (i32, i32) {
    %c0_i32 = arith.constant 0 : i32
    %c0_i32_0 = arith.constant 0 : i32
    %c0_i32_1 = arith.constant 0 : i32
    return %c0_i32, %c0_i32_0 : i32, i32
  }
  func.func @transform_3(%arg0: i32) -> (i32, i32) {
    %c0_i32 = arith.constant 0 : i32
    %c0_i32_0 = arith.constant 0 : i32
    %c0_i32_1 = arith.constant 0 : i32
    return %c0_i32, %c0_i32_0 : i32, i32
  }
  func.func @transform_4(%arg0: i32) -> (i32, i32) {
    %c0_i32 = arith.constant 0 : i32
    %c0_i32_0 = arith.constant 0 : i32
    %c0_i32_1 = arith.constant 0 : i32
    return %c0_i32, %c0_i32_0 : i32, i32
  }
  func.func @transform_5(%arg0: i32) -> (i32, i32) {
    %c0_i32 = arith.constant 0 : i32
    %c0_i32_0 = arith.constant 0 : i32
    return %c0_i32, %arg0 : i32, i32
  }
}

</mosaic_0001>

<bundles_post_ra>
// kernel: tpu_custom_call.1
= control target key start
LH: loop header
LB: loop body
LE: loop exit
PB: predicated region body
PF: predicated region fallthrough
CT: control target
= control target key end

     0   :  { %s563_s0 = inlined_call_operand.vmem [shape: f32[8,100], index: 0, kind: input, shape index: {}]   ;;  %s564_s1 = inlined_call_operand.vmem [shape: bf16[100,128], index: 1, kind: input, shape index: {}]   ;;  %s565_s2 = inlined_call_operand.vmem [shape: f32[1,128], index: 2, kind: input, shape index: {}]   ;;  %s566_s3 = inlined_call_operand.vmem [shape: f32[128,1], index: 3, kind: input, shape index: {}]   ;;  %s567_s4 = inlined_call_operand.<no memory space> [shape: f32[1,1], index: 4, kind: input, shape index: {}]   ;;  %s568_s5 = inlined_call_operand.hbm [shape: f32[2,8], index: 5, kind: output, shape index: {}]  }
   0x1   :  { %v10_v0 = vstv %s567_s4 }
   0x2   :  { %11 = vst [vmem:[#allocation2] sm:$0x1] %v10_v0 }
   0x3   :  { %v403_v1 = vld [vmem:[%s564_s1] sm:$0xff]   ;;  %v438_v2 = vmov 0.0   ;;  %v404_v3 = vld [vmem:[%s564_s1 + $0x8] sm:$0xff]   ;;  %vm439_vm0 = vmmov 0   ;;  %v440_v4 = vmov 0.0|0.0   ;;  %v405_v5 = vld [vmem:[%s564_s1 + $0x10] sm:$0xff]  }
   0x4   :  { %320 = vmatprep.subr.bf16.mxu0 %v438_v2  ;;  %334 = vmatprep.mubr.msk.bf16.mxu0 %vm439_vm0, %v438_v2  ;;  %v134_v6 = vld [vmem:[%s566_s3] sm:$0xff]  ;;  %v135_v7 = vld [vmem:[%s566_s3 + $0x8] sm:$0xff]  ;;  %v136_v8 = vld [vmem:[%s566_s3 + $0x10] sm:$0xff] }
   0x5   :  { %321 = vmatpush3.bf16.msra.mxu0 %v403_v1  ;;  %370 = vmatprep.mubr.msk.f32.mxu1 %vm439_vm0, %v438_v2  ;;  %v374_v9 = vpack.c.bf16 %v135_v7, %v134_v6  ;;  %v137_v10 = vld [vmem:[%s566_s3 + $0x18] sm:$0xff]  ;;  %v138_v13 = vld [vmem:[%s566_s3 + $0x20] sm:$0xff]  ;;  %v139_v14 = vld [vmem:[%s566_s3 + $0x28] sm:$0xff] }
   0x6   :  { %322 = vmatprep.subr.bf16.mxu0 %v438_v2  ;;  %373 = vmatprep.subr.bf16.mxu1 %v440_v4  ;;  %v406_v11 = vld [vmem:[%s564_s1 + $0x18] sm:$0xff]   ;;  %v377_v12 = vpack.c.bf16 %v137_v10, %v136_v8 }
   0x7   :  { %375 = vmatpush3.bf16.msra.mxu1 %v374_v9 }
   0x8   :  { %376 = vmatprep.subr.bf16.mxu1 %v440_v4 }
   0x9   :  { %323 = vmatpush3.bf16.msra.mxu0 %v404_v3 }
   0xa   :  { %324 = vmatprep.subr.bf16.mxu0 %v438_v2 }
   0xd   :  { %325 = vmatpush3.bf16.msra.mxu0 %v405_v5 }
   0xe   :  { %326 = vmatprep.subr.bf16.mxu0 %v438_v2 }
   0xf   :  { %12 = vsyncpa [#allocation4], 0  ;;  %v407_v15 = vld [vmem:[%s564_s1 + $0x20] sm:$0xff]   ;;  %378 = vmatpush3.bf16.msra.mxu1 %v377_v12  ;;  %v380_v16 = vpack.c.bf16 %v139_v14, %v138_v13  ;;  %v140_v17 = vld [vmem:[%s566_s3 + $0x30] sm:$0xff]  ;;  %vm89_vm1 = vcmask 1041408   ;;  %vm85_vm2 = vcmask 818176   ;;  %v258_v48 = vlaneseq }
  0x10   :  { %379 = vmatprep.subr.bf16.mxu1 %v440_v4  ;;  %v141_v18 = vld [vmem:[%s566_s3 + $0x38] sm:$0xff]  ;;  %v408_v19 = vld [vmem:[%s564_s1 + $0x28] sm:$0xff]   ;;  %v409_v21 = vld [vmem:[%s564_s1 + $0x30] ss:$0 sps:$4 sm:$0x33]   ;;  %v441_v38 = vmov 0  }
  0x11   :  { %327 = vmatpush3.bf16.msra.mxu0 %v406_v11  ;;  %v383_v20 = vpack.c.bf16 %v141_v18, %v140_v17  ;;  %v142_v22 = vld [vmem:[%s566_s3 + $0x40] sm:$0xff]  ;;  %v143_v23 = vld [vmem:[%s566_s3 + $0x48] sm:$0xff]  ;;  %v91_v26 = vsel %vm89_vm1, %v409_v21, 0  ;;  %v144_v27 = vld [vmem:[%s566_s3 + $0x50] sm:$0xff]  ;;  %402 = vset.pattern.permute.xlu0 %v441_v38  ;;  %v259_v49 = vshrl.u32 %v258_v48, 7  ;;  %vm269_vm3 = vcmask 57344  }
  0x12   :  { %328 = vmatprep.subr.bf16.mxu0 %v438_v2  ;;  %v24_v24 = vld [vmem:[%s563_s0] sm:$0xff]  ;;  %v386_v25 = vpack.c.bf16 %v143_v23, %v142_v22  ;;  %v145_v28 = vld [vmem:[%s566_s3 + $0x58] sm:$0xff]  ;;  %v147_v32 = vld [vmem:[%s566_s3 + $0x68] sm:$0xff] }
  0x13   :  { %381 = vmatpush3.bf16.msra.mxu1 %v380_v16  ;;  %v25_v29 = vpack.c.bf16 %v24_v24, %v24_v24  ;;  %v389_v30 = vpack.c.bf16 %v145_v28, %v144_v27  ;;  %v146_v31 = vld [vmem:[%s566_s3 + $0x60] sm:$0xff]  ;;  %v148_v34 = vld [vmem:[%s566_s3 + $0x70] sm:$0xff]  ;;  %v149_v35 = vld [vmem:[%s566_s3 + $0x78] sm:$0xff]  ;;  %v260_v50 = vsub.s32 0, %v259_v49 }
  0x14   :  { %382 = vmatprep.subr.bf16.mxu1 %v440_v4  ;;  %v392_v33 = vpack.c.bf16 %v147_v32, %v146_v31  ;;  %v395_v36 = vpack.c.bf16 %v149_v35, %v148_v34  ;;  %v252_v37 = vld [vmem:[#allocation2] sm:$0x1] }
  0x15   :  { %329 = vmatpush3.bf16.msra.mxu0 %v407_v15  ;;  %255 = vperm.xlu0 %402, %v252_v37   ;;  %v286_v39 = vld [vmem:[%s565_s2] ss:$0 sm:$0xff]  ;;  %s442_s2 = smov [#allocation3]  }
  0x16   :  { %330 = vmatprep.subr.bf16.mxu0 %v438_v2  ;;  %s278_s3 = sshll.u32 %s442_s2, 4  ;;  %s279_s3 = int_to_ptr.vmem [resolvable:$true] %s278_s3 }
  0x17   :  { %384 = vmatpush3.bf16.msra.mxu1 %v383_v20  ;;  %s414_s16 = scalar_lea.vmem %s279_s3, 32  ;;  %p419_p1 = scmp.lt.s32.totalorder %s279_s3, %s279_s3 }
  0x18   :  { %385 = vmatprep.subr.bf16.mxu1 %v440_v4  ;;  %p415_p0 = scmp.ne.s32.totalorder %s279_s3, %s414_s16  ;;  %p420_p2 = scmp.lt.s32.totalorder %s414_s16, %s414_s16 }
  0x19   :  { %331 = vmatpush3.bf16.msra.mxu0 %v408_v19 }
  0x1a   :  { %332 = vmatprep.subr.bf16.mxu0 %v438_v2  ;;  %p421_p3 = por %p420_p2, %p419_p1 }
  0x1b   :  { %387 = vmatpush3.bf16.msra.mxu1 %v386_v25 }
  0x1c   :  { %388 = vmatprep.subr.bf16.mxu1 %v440_v4  ;;  %p422_p4 = pnand %p421_p3, %p415_p0 }
  0x1d   :  { %333 = vmatpush3.bf16.msra.mxu0 %v91_v26 }
  0x1f   :  { %390 = vmatpush3.bf16.msra.mxu1 %v389_v30 }
  0x20   :  { %335 = vmatmul.mubr.msk.bf16.vlgmr.msra.gmra.mrb[0].mxu0 %vm85_vm2, %v25_v29  ;;  %391 = vmatprep.subr.bf16.mxu1 %v440_v4 }
  0x23   :  { %393 = vmatpush3.bf16.msra.mxu1 %v392_v33 }
  0x24   :  { %394 = vmatprep.subr.bf16.mxu1 %v440_v4 }
  0x27   :  { %396 = vmatpush3.bf16.msra.mxu1 %v395_v36 }
  0x94   :  { %v256_v51 = vpop.permute.xlu0 %255 }
  0x95   :  { %v261_v52 = vrot.slane %v256_v51, %v260_v50 }
  0xf3   :  { %v127_v40 = vpop.f32.mrb[0].mxu0 }
  0xf4   :  { %v128_v41 = vadd.f32 %v286_v39, %v127_v40  ;;  %v336_v42 = vpop.f32.mrb[1].mxu0 }
  0xf5   :  { %v130_v43 = vpop.f32.mrb[2].mxu0 }
  0xf6   :  { %v133_v44 = vmax.f32 %v128_v41, 0.0  ;;  %v337_v45 = vpop.f32.mrb[3].mxu0 }
  0xf8   :  { %371 = vmatmul.mubr.f32.vlgmr.msra.gmra.mrb[0].mxu1 %v133_v44 }
 0x1cb   :  { %v216_v46 = vpop.f32.mrb[0].mxu1 }
 0x1cc   :  { %220 = vxpose.xlu0.b32.start.end [1/1] (short) (narrow) %v216_v46, 8  ;;  %v372_v47 = vpop.f32.mrb[1].mxu1 }
 0x24c   :  { %v236_v53 = vpop.trf.xlu0 }
 0x24d   :  { %v262_v54 = vadd.f32 %v261_v52, %v236_v53 }
 0x24f   :  { %v263_v55 = vsub.f32 0.0, %v262_v54 }
 0x251   :  { %v264_v56 = vmul.f32 1.442695, %v263_v55 }
 0x253   :  { %410 = vpow2.f32 %v264_v56 }
 0x25d   :  { %v411_v57 = vpop.eup %410 }
 0x25e   :  { %v266_v58 = vadd.f32 1.0, %v411_v57 }
 0x260   :  { %412 = vrcp.f32 %v266_v58 }
 0x26a   :  { %v413_v59 = vpop.eup %412 }
 0x26b   :  { %v268_v60 = vsub.f32 1.0, %v413_v59  ;;  %271 = vst.msk [vmem:[#allocation3 + $0x1] sm:$0x1] %vm269_vm3, %v413_v59 }
 0x26d   :  { %270 = vst.msk [vmem:[#allocation3] sm:$0x1] %vm269_vm3, %v268_v60 }
 0x26e   :  { %425 = shalt.err (!%p422_p4)
}
 0x26f   :  { %s426_s19 = scalar_lea.hbm %s568_s5, 32 }
 0x270   :  { %p427_p5 = scmp.ne.s32.totalorder %s568_s5, %s426_s19  ;;  %p430_p6 = scmp.lt.u32.totalorder %s426_s19, %s568_s5 }
 0x272   :  { %p432_p7 = pnand %p430_p6, %p427_p5 }
 0x274   :  { %435 = shalt.err (!%p432_p7)
}
 0x275   :  { %281 = dma.vmem_to_hbm [thread:$0]  %s279_s3, 32, %s568_s5, [#allocation4]  }
 0x276   :  { %436 = dma.done.wait [#allocation4], 32  }
 0x277   :  { %437 = vsyncadd [#allocation4], 4294967264 }
 0x278   :  { %285 = vsyncpa [#allocation4], 1 }

</bundles_post_ra>
